<compile_context>
chip_gen: v5e
topology: v5e:2x2
jax: 0.10.0
libtpu: 0.0.40
codegen_flags: <defaults>
</compile_context>

<pallas_src>
import jax
import jax.numpy as jnp
from jax.experimental import pallas as pl
from jax.experimental.pallas import tpu as pltpu

INPUT_SIZE = 1024
HIDDEN_SIZE = 1
GATES = 4 * HIDDEN_SIZE

# Target ~4 MiB input blocks: big enough to amortize per-step overhead on all
# generations, small enough that double-buffering stays well inside VMEM even
# on v5e (with the 32 MiB scoped limit below).
_MAX_BLOCK_BYTES = 4 * 1024 * 1024


def _round_up(x, m):
    return (x + m - 1) // m * m


def lstm_zero_state_kernel(x_ref, w_ref, b_ref, h_ref, c_ref):
    # x: (TB, 1024) native dtype     w: (1024, 4) bf16 (pre-transposed W_ih.T)
    # b: (1, 4) f32 (b_ih + b_hh)    h/c: (TB, 1) f32
    xb = x_ref[...].astype(w_ref.dtype)            # VPU cast in VMEM (free-ish)
    gates = jnp.dot(xb, w_ref[...],
                    preferred_element_type=jnp.float32)   # (TB, 4), MXU-canonical
    gates = gates + b_ref[...]                     # (1, 4) broadcast

    # PyTorch LSTMCell gate order: i, f, g, o.  With c0 == 0 the f-gate term
    # vanishes, so it is not computed at all.
    i_g = jax.nn.sigmoid(gates[:, 0:1])
    g_g = jnp.tanh(gates[:, 2:3])
    o_g = jax.nn.sigmoid(gates[:, 3:4])

    c_new = i_g * g_g
    h_new = o_g * jnp.tanh(c_new)

    h_ref[...] = h_new.astype(h_ref.dtype)
    c_ref[...] = c_new.astype(c_ref.dtype)


def prepare_params(w_ih, w_hh, b_ih, b_hh, compute_dtype=jnp.bfloat16):
    """One-time parameter prep (hoisted out of the per-call forward path)."""
    del w_hh  # h0 == 0 => h0 @ W_hh.T == 0; the recurrent weight never matters.
    # TODO(synk): a provided-(h0, c0) path (broadcast h0 * W_hh row on the VPU)
    # is omitted — RewardPrediction.forward always calls the cell with zero state.
    w_t = jnp.asarray(w_ih).astype(compute_dtype).T            # (1024, 4)
    b = (jnp.asarray(b_ih, jnp.float32)
         + jnp.asarray(b_hh, jnp.float32)).reshape(1, GATES)   # (1, 4)
    return w_t, b


@jax.jit
def reward_prediction_forward(x, params):
    """Pallas forward of RewardPrediction (LSTMCell(1024, 1), zero state).

    x: (B, 1024), f32 or bf16. Returns (h', c'), each (B, 1) f32, matching
    torch.nn.LSTMCell's output tuple.
    """
    w, b = params
    B, F = x.shape
    assert F == INPUT_SIZE

    # Tile selection: ~4 MiB blocks; >= 2 grid steps when B is large enough so
    # dimension_semantics=("parallel",) can split across v7x's two TensorCores.
    max_tb = max(8, _MAX_BLOCK_BYTES // (INPUT_SIZE * x.dtype.itemsize))
    if B <= 8:
        tb = B                                    # single full-array block
    else:
        tb = min(max_tb, _round_up(pl.cdiv(B, 2), 8))
    grid = (pl.cdiv(B, tb),)                      # partial last block is masked

    cost = pl.CostEstimate(
        flops=2 * B * INPUT_SIZE * GATES,
        transcendentals=4 * B,
        bytes_accessed=B * INPUT_SIZE * x.dtype.itemsize
        + INPUT_SIZE * GATES * 2 + 2 * B * HIDDEN_SIZE * 4 + GATES * 4,
    )

    h_new, c_new = pl.pallas_call(
        lstm_zero_state_kernel,
        out_shape=(
            jax.ShapeDtypeStruct((B, HIDDEN_SIZE), jnp.float32),
            jax.ShapeDtypeStruct((B, HIDDEN_SIZE), jnp.float32),
        ),
        grid=grid,
        in_specs=[
            pl.BlockSpec((tb, INPUT_SIZE), lambda i: (i, 0)),      # x row block
            pl.BlockSpec((INPUT_SIZE, GATES), lambda i: (0, 0)),   # W_ih.T resident
            pl.BlockSpec((1, GATES), lambda i: (0, 0)),            # bias resident
        ],
        out_specs=(
            pl.BlockSpec((tb, HIDDEN_SIZE), lambda i: (i, 0)),     # h'
            pl.BlockSpec((tb, HIDDEN_SIZE), lambda i: (i, 0)),     # c'
        ),
        compiler_params=pltpu.CompilerParams(
            dimension_semantics=("parallel",),
            vmem_limit_bytes=32 * 1024 * 1024,   # only raises v5e's 16 MiB default
        ),
        cost_estimate=cost,
    )(x, w, b)

    return h_new, c_new


def _reference(x, w_ih, w_hh, b_ih, b_hh):
    """Pure-JAX reference matching torch.nn.LSTMCell with zero initial state."""
    B = x.shape[0]
    h0 = jnp.zeros((B, HIDDEN_SIZE), jnp.float32)
    c0 = jnp.zeros((B, HIDDEN_SIZE), jnp.float32)
    gates = x @ w_ih.T + b_ih + h0 @ w_hh.T + b_hh
    i, f, g, o = jnp.split(gates, 4, axis=1)
    c_new = jax.nn.sigmoid(f) * c0 + jax.nn.sigmoid(i) * jnp.tanh(g)
    h_new = jax.nn.sigmoid(o) * jnp.tanh(c_new)
    return h_new, c_new


if __name__ == "__main__":
    key = jax.random.PRNGKey(0)
    k_x, k_wih, k_whh, k_bih, k_bhh = jax.random.split(key, 5)

    B = 8
    # Same uniform(-1/sqrt(H), 1/sqrt(H)) scheme as torch.nn.LSTMCell (H = 1).
    bound = 1.0
    x = jax.random.normal(k_x, (B, INPUT_SIZE), jnp.float32)
    w_ih = jax.random.uniform(k_wih, (GATES, INPUT_SIZE), jnp.float32, -bound, bound)
    w_hh = jax.random.uniform(k_whh, (GATES, HIDDEN_SIZE), jnp.float32, -bound, bound)
    b_ih = jax.random.uniform(k_bih, (GATES,), jnp.float32, -bound, bound)
    b_hh = jax.random.uniform(k_bhh, (GATES,), jnp.float32, -bound, bound)

    # One-time param prep (bf16 pre-transposed weight, folded bias).
    params = prepare_params(w_ih, w_hh, b_ih, b_hh, compute_dtype=jnp.bfloat16)

    h_out, c_out = reward_prediction_forward(x, params)
    jax.block_until_ready((h_out, c_out))

    # Reference on bf16-rounded operands (kernel casts x/w to bf16, accumulates f32).
    x_ref = x.astype(jnp.bfloat16).astype(jnp.float32)
    w_ref = w_ih.astype(jnp.bfloat16).astype(jnp.float32)
    h_ref, c_ref = _reference(x_ref, w_ref, w_hh, b_ih, b_hh)

    assert h_out.shape == (B, HIDDEN_SIZE) and c_out.shape == (B, HIDDEN_SIZE)
    assert jnp.allclose(h_out, h_ref, atol=2e-3, rtol=2e-3), (
        float(jnp.max(jnp.abs(h_out - h_ref))))
    assert jnp.allclose(c_out, c_ref, atol=2e-3, rtol=2e-3), (
        float(jnp.max(jnp.abs(c_out - c_ref))))

    print("KERNEL_OK")
</pallas_src>

<mosaic_0001>
module attributes {stable_mosaic.version = 11 : i64} {
  func.func @lstm_zero_state_kernel(%arg0: i32, %arg1: memref<8x1024xf32, #tpu.memory_space<vmem>>, %arg2: memref<1024x4xbf16, #tpu.memory_space<vmem>>, %arg3: memref<1x4xf32, #tpu.memory_space<vmem>>, %arg4: memref<8x1xf32, #tpu.memory_space<vmem>>, %arg5: memref<8x1xf32, #tpu.memory_space<vmem>>) attributes {dimension_semantics = [#tpu.dimension_semantics<parallel>], iteration_bounds = array<i64: 1>, scalar_prefetch = 0 : i64, scratch_operands = 0 : i64, tpu.core_type = #tpu.core_type<tc>, window_params = [{transform_indices = @transform_0, window_bounds = array<i64: 8, 1024>}, {pipeline_mode = #tpu.pipeline_mode<synchronous>, transform_indices = @transform_1, window_bounds = array<i64: 1024, 4>}, {pipeline_mode = #tpu.pipeline_mode<synchronous>, transform_indices = @transform_2, window_bounds = array<i64: 1, 4>}, {transform_indices = @transform_3, window_bounds = array<i64: 8, 1>}, {transform_indices = @transform_4, window_bounds = array<i64: 8, 1>}]} {
    %c0 = arith.constant 0 : index
    %c0_0 = arith.constant 0 : index
    %0 = vector.load %arg1[%c0, %c0_0] : memref<8x1024xf32, #tpu.memory_space<vmem>>, vector<8x1024xf32>
    %1 = arith.truncf %0 : vector<8x1024xf32> to vector<8x1024xbf16>
    %c0_1 = arith.constant 0 : index
    %c0_2 = arith.constant 0 : index
    %2 = vector.load %arg2[%c0_1, %c0_2] : memref<1024x4xbf16, #tpu.memory_space<vmem>>, vector<1024x4xbf16>
    %cst = arith.constant dense<0.000000e+00> : vector<8x4xf32>
    %3 = tpu.matmul %1, %2, %cst {dimension_numbers = #tpu.dot_dimension_numbers<[1], [0], [0], [1], [0, 0, 1, 1], [], []>} : vector<8x1024xbf16>, vector<1024x4xbf16>, vector<8x4xf32> -> vector<8x4xf32>
    %c0_3 = arith.constant 0 : index
    %c0_4 = arith.constant 0 : index
    %4 = vector.load %arg3[%c0_3, %c0_4] : memref<1x4xf32, #tpu.memory_space<vmem>>, vector<1x4xf32>
    %5 = vector.broadcast %4 : vector<1x4xf32> to vector<8x4xf32>
    %6 = arith.addf %3, %5 : vector<8x4xf32>
    %7 = vector.extract_strided_slice %6 {offsets = [0, 0], sizes = [8, 1], strides = [1, 1]} : vector<8x4xf32> to vector<8x1xf32>
    %8 = arith.negf %7 : vector<8x1xf32>
    %9 = math.exp %8 : vector<8x1xf32>
    %cst_5 = arith.constant 1.000000e+00 : f32
    %10 = vector.broadcast %cst_5 : f32 to vector<8x1xf32>
    %11 = arith.addf %10, %9 : vector<8x1xf32>
    %12 = arith.divf %10, %11 : vector<8x1xf32>
    %13 = vector.extract_strided_slice %6 {offsets = [0, 2], sizes = [8, 1], strides = [1, 1]} : vector<8x4xf32> to vector<8x1xf32>
    %14 = math.tanh %13 : vector<8x1xf32>
    %15 = vector.extract_strided_slice %6 {offsets = [0, 3], sizes = [8, 1], strides = [1, 1]} : vector<8x4xf32> to vector<8x1xf32>
    %16 = arith.negf %15 : vector<8x1xf32>
    %17 = math.exp %16 : vector<8x1xf32>
    %cst_6 = arith.constant 1.000000e+00 : f32
    %18 = vector.broadcast %cst_6 : f32 to vector<8x1xf32>
    %19 = arith.addf %18, %17 : vector<8x1xf32>
    %20 = arith.divf %18, %19 : vector<8x1xf32>
    %21 = arith.mulf %12, %14 : vector<8x1xf32>
    %22 = math.tanh %21 : vector<8x1xf32>
    %23 = arith.mulf %20, %22 : vector<8x1xf32>
    %c0_7 = arith.constant 0 : index
    %c0_8 = arith.constant 0 : index
    %24 = vector.load %arg4[%c0_7, %c0_8] : memref<8x1xf32, #tpu.memory_space<vmem>>, vector<8x1xf32>
    tpu.vector_store %arg4[%c0_7, %c0_8], %23 {strides = array<i32>} : memref<8x1xf32, #tpu.memory_space<vmem>>, vector<8x1xf32>,
    %c0_9 = arith.constant 0 : index
    %c0_10 = arith.constant 0 : index
    %25 = vector.load %arg5[%c0_9, %c0_10] : memref<8x1xf32, #tpu.memory_space<vmem>>, vector<8x1xf32>
    tpu.vector_store %arg5[%c0_9, %c0_10], %21 {strides = array<i32>} : memref<8x1xf32, #tpu.memory_space<vmem>>, vector<8x1xf32>,
    return
  }
  func.func @transform_0(%arg0: i32) -> (i32, i32) {
    %c0_i32 = arith.constant 0 : i32
    %c0_i32_0 = arith.constant 0 : i32
    return %arg0, %c0_i32 : i32, i32
  }
  func.func @transform_1(%arg0: i32) -> (i32, i32) {
    %c0_i32 = arith.constant 0 : i32
    %c0_i32_0 = arith.constant 0 : i32
    %c0_i32_1 = arith.constant 0 : i32
    return %c0_i32, %c0_i32_0 : i32, i32
  }
  func.func @transform_2(%arg0: i32) -> (i32, i32) {
    %c0_i32 = arith.constant 0 : i32
    %c0_i32_0 = arith.constant 0 : i32
    %c0_i32_1 = arith.constant 0 : i32
    return %c0_i32, %c0_i32_0 : i32, i32
  }
  func.func @transform_3(%arg0: i32) -> (i32, i32) {
    %c0_i32 = arith.constant 0 : i32
    %c0_i32_0 = arith.constant 0 : i32
    return %arg0, %c0_i32 : i32, i32
  }
  func.func @transform_4(%arg0: i32) -> (i32, i32) {
    %c0_i32 = arith.constant 0 : i32
    %c0_i32_0 = arith.constant 0 : i32
    return %arg0, %c0_i32 : i32, i32
  }
}

</mosaic_0001>

<bundles_post_ra>
// kernel: reward_prediction_forward.1
= control target key start
LH: loop header
LB: loop body
LE: loop exit
PB: predicated region body
PF: predicated region fallthrough
CT: control target
= control target key end

     0   :  { %vm687_vm4 = vcmask 7168   ;;  %s1032_s5 = smov 3   ;;  %s1033_s6 = smov 125   ;;  %s1284_s1 = inlined_call_operand.vmem [shape: bf16[1024,4], index: 1, kind: input, shape index: {}]   ;;  %s1285_s2 = inlined_call_operand.vmem [shape: f32[1,4], index: 2, kind: input, shape index: {}]   ;;  %s1286_s0 = inlined_call_operand.vmem [shape: f32[8,1024], index: 0, kind: input, shape index: {}]   ;;  %s1287_s4 = inlined_call_operand.vmem [shape: f32[8,1], index: 4, kind: output, shape index: {1}]   ;;  %s1288_s3 = inlined_call_operand.vmem [shape: f32[8,1], index: 3, kind: output, shape index: {0}]  }
   0x1   :  { %v962_v0 = vld [vmem:[%s1284_s1 + $0x38] sm:$0xff]  ;;  %v961_v4 = vld [vmem:[%s1284_s1 + $0x30] sm:$0xff]  ;;  %v960_v8 = vld [vmem:[%s1284_s1 + $0x28] sm:$0xff] }
   0x2   :  { %v970_v1 = vld [vmem:[%s1284_s1 + $0x78] sm:$0xff]  ;;  %548 = vmatpush.bf16.msra.mxu0 %v962_v0  ;;  %v969_v5 = vld [vmem:[%s1284_s1 + $0x70] sm:$0xff]  ;;  %v968_v9 = vld [vmem:[%s1284_s1 + $0x68] sm:$0xff] }
   0x3   :  { %v978_v2 = vld [vmem:[%s1284_s1 + $0xb8] sm:$0xff]  ;;  %561 = vmatpush.bf16.msra.mxu1 %v970_v1  ;;  %v977_v6 = vld [vmem:[%s1284_s1 + $0xb0] sm:$0xff]  ;;  %v976_v10 = vld [vmem:[%s1284_s1 + $0xa8] sm:$0xff] }
   0x4   :  { %v986_v3 = vld [vmem:[%s1284_s1 + $0xf8] sm:$0xff]  ;;  %574 = vmatpush.bf16.msra.mxu2 %v978_v2  ;;  %v985_v7 = vld [vmem:[%s1284_s1 + $0xf0] sm:$0xff]  ;;  %v984_v11 = vld [vmem:[%s1284_s1 + $0xe8] sm:$0xff] }
   0x5   :  { %587 = vmatpush.bf16.msra.mxu3 %v986_v3  ;;  %v959_v12 = vld [vmem:[%s1284_s1 + $0x20] sm:$0xff]  ;;  %v958_v16 = vld [vmem:[%s1284_s1 + $0x18] sm:$0xff]  ;;  %v957_v20 = vld [vmem:[%s1284_s1 + $0x10] sm:$0xff] }
   0x6   :  { %549 = vmatpush.bf16.msra.mxu0 %v961_v4  ;;  %v967_v13 = vld [vmem:[%s1284_s1 + $0x60] sm:$0xff]  ;;  %v966_v17 = vld [vmem:[%s1284_s1 + $0x58] sm:$0xff]  ;;  %v965_v21 = vld [vmem:[%s1284_s1 + $0x50] sm:$0xff] }
   0x7   :  { %562 = vmatpush.bf16.msra.mxu1 %v969_v5  ;;  %v975_v14 = vld [vmem:[%s1284_s1 + $0xa0] sm:$0xff]  ;;  %v974_v18 = vld [vmem:[%s1284_s1 + $0x98] sm:$0xff]  ;;  %v973_v22 = vld [vmem:[%s1284_s1 + $0x90] sm:$0xff] }
   0x8   :  { %575 = vmatpush.bf16.msra.mxu2 %v977_v6  ;;  %v983_v15 = vld [vmem:[%s1284_s1 + $0xe0] sm:$0xff]  ;;  %v982_v19 = vld [vmem:[%s1284_s1 + $0xd8] sm:$0xff]  ;;  %v981_v23 = vld [vmem:[%s1284_s1 + $0xd0] sm:$0xff] }
   0x9   :  { %588 = vmatpush.bf16.msra.mxu3 %v985_v7  ;;  %v956_v24 = vld [vmem:[%s1284_s1 + $0x8] sm:$0xff]  ;;  %v955_v28 = vld [vmem:[%s1284_s1] sm:$0xff]  ;;  %v994_v32 = vld [vmem:[%s1284_s1 + $0x138] sm:$0xff] }
   0xa   :  { %550 = vmatpush.bf16.msra.mxu0 %v960_v8  ;;  %v964_v25 = vld [vmem:[%s1284_s1 + $0x48] sm:$0xff]  ;;  %v963_v29 = vld [vmem:[%s1284_s1 + $0x40] sm:$0xff]  ;;  %v18_v33 = vld [vmem:[%s1286_s0 + $0x10] sm:$0xff] }
   0xb   :  { %563 = vmatpush.bf16.msra.mxu1 %v968_v9  ;;  %v972_v26 = vld [vmem:[%s1284_s1 + $0x88] sm:$0xff]  ;;  %v971_v30 = vld [vmem:[%s1284_s1 + $0x80] sm:$0xff]  ;;  %v1002_v35 = vld [vmem:[%s1284_s1 + $0x178] sm:$0xff]  ;;  %v26_v40 = vpack.c.bf16 %v18_v33, %v18_v33 }
   0xc   :  { %576 = vmatpush.bf16.msra.mxu2 %v976_v10  ;;  %v980_v27 = vld [vmem:[%s1284_s1 + $0xc8] sm:$0xff]  ;;  %v979_v31 = vld [vmem:[%s1284_s1 + $0xc0] sm:$0xff]  ;;  %v19_v36 = vld [vmem:[%s1286_s0 + $0x18] sm:$0xff] }
   0xd   :  { %589 = vmatpush.bf16.msra.mxu3 %v984_v11  ;;  %v16_v34 = vld [vmem:[%s1286_s0] sm:$0xff]  ;;  %v17_v37 = vld [vmem:[%s1286_s0 + $0x8] sm:$0xff]  ;;  %v1010_v38 = vld [vmem:[%s1284_s1 + $0x1b8] sm:$0xff]  ;;  %v27_v42 = vpack.c.bf16 %v19_v36, %v19_v36 }
   0xe   :  { %551 = vmatpush.bf16.msra.mxu0 %v959_v12  ;;  %v1018_v39 = vld [vmem:[%s1284_s1 + $0x1f8] sm:$0xff]  ;;  %v24_v41 = vpack.c.bf16 %v16_v34, %v16_v34  ;;  %v25_v43 = vpack.c.bf16 %v17_v37, %v17_v37  ;;  %v993_v44 = vld [vmem:[%s1284_s1 + $0x130] sm:$0xff]  ;;  %v992_v48 = vld [vmem:[%s1284_s1 + $0x128] sm:$0xff] }
   0xf   :  { %564 = vmatpush.bf16.msra.mxu1 %v967_v13  ;;  %v1001_v45 = vld [vmem:[%s1284_s1 + $0x170] sm:$0xff]  ;;  %v1000_v49 = vld [vmem:[%s1284_s1 + $0x168] sm:$0xff]  ;;  %v991_v52 = vld [vmem:[%s1284_s1 + $0x120] sm:$0xff] }
  0x10   :  { %577 = vmatpush.bf16.msra.mxu2 %v975_v14  ;;  %v1009_v46 = vld [vmem:[%s1284_s1 + $0x1b0] sm:$0xff]  ;;  %v1008_v50 = vld [vmem:[%s1284_s1 + $0x1a8] sm:$0xff]  ;;  %v999_v53 = vld [vmem:[%s1284_s1 + $0x160] sm:$0xff] }
  0x11   :  { %590 = vmatpush.bf16.msra.mxu3 %v983_v15  ;;  %v1017_v47 = vld [vmem:[%s1284_s1 + $0x1f0] sm:$0xff]  ;;  %v1016_v51 = vld [vmem:[%s1284_s1 + $0x1e8] sm:$0xff]  ;;  %v1007_v54 = vld [vmem:[%s1284_s1 + $0x1a0] sm:$0xff] }
  0x12   :  { %552 = vmatpush.bf16.msra.mxu0 %v958_v16  ;;  %v1015_v55 = vld [vmem:[%s1284_s1 + $0x1e0] sm:$0xff]  ;;  %v990_v56 = vld [vmem:[%s1284_s1 + $0x118] sm:$0xff]  ;;  %v989_v60 = vld [vmem:[%s1284_s1 + $0x110] sm:$0xff] }
  0x13   :  { %565 = vmatpush.bf16.msra.mxu1 %v966_v17  ;;  %v998_v57 = vld [vmem:[%s1284_s1 + $0x158] sm:$0xff]  ;;  %v997_v61 = vld [vmem:[%s1284_s1 + $0x150] sm:$0xff]  ;;  %v988_v0 = vld [vmem:[%s1284_s1 + $0x108] sm:$0xff] }
  0x14   :  { %578 = vmatpush.bf16.msra.mxu2 %v974_v18  ;;  %v1006_v58 = vld [vmem:[%s1284_s1 + $0x198] sm:$0xff]  ;;  %v1005_v62 = vld [vmem:[%s1284_s1 + $0x190] sm:$0xff]  ;;  %v996_v1 = vld [vmem:[%s1284_s1 + $0x148] sm:$0xff] }
  0x15   :  { %591 = vmatpush.bf16.msra.mxu3 %v982_v19  ;;  %v1014_v59 = vld [vmem:[%s1284_s1 + $0x1d8] sm:$0xff]  ;;  %v1013_v63 = vld [vmem:[%s1284_s1 + $0x1d0] sm:$0xff]  ;;  %v1004_v2 = vld [vmem:[%s1284_s1 + $0x188] sm:$0xff] }
  0x16   :  { %553 = vmatpush.bf16.msra.mxu0 %v957_v20  ;;  %v1012_v3 = vld [vmem:[%s1284_s1 + $0x1c8] sm:$0xff]  ;;  %v987_v4 = vld [vmem:[%s1284_s1 + $0x100] sm:$0xff]  ;;  %v22_v10 = vld [vmem:[%s1286_s0 + $0x30] sm:$0xff] }
  0x17   :  { %566 = vmatpush.bf16.msra.mxu1 %v965_v21  ;;  %v995_v5 = vld [vmem:[%s1284_s1 + $0x140] sm:$0xff]  ;;  %v21_v8 = vld [vmem:[%s1286_s0 + $0x28] sm:$0xff]  ;;  %v23_v11 = vld [vmem:[%s1286_s0 + $0x38] sm:$0xff]  ;;  %v30_v14 = vpack.c.bf16 %v22_v10, %v22_v10 }
  0x18   :  { %579 = vmatpush.bf16.msra.mxu2 %v973_v22  ;;  %v1003_v6 = vld [vmem:[%s1284_s1 + $0x180] sm:$0xff]  ;;  %v29_v13 = vpack.c.bf16 %v21_v8, %v21_v8  ;;  %v31_v15 = vpack.c.bf16 %v23_v11, %v23_v11 }
  0x19   :  { %592 = vmatpush.bf16.msra.mxu3 %v981_v23  ;;  %v20_v7 = vld [vmem:[%s1286_s0 + $0x20] sm:$0xff] }
  0x1a   :  { %554 = vmatpush.bf16.msra.mxu0 %v956_v24  ;;  %v1011_v9 = vld [vmem:[%s1284_s1 + $0x1c0] sm:$0xff]  ;;  %v28_v12 = vpack.c.bf16 %v20_v7, %v20_v7 }
  0x1b   :  { %567 = vmatpush.bf16.msra.mxu1 %v964_v25  ;;  %v1022_v22 = vld [vmem:[%s1285_s2] ss:$0 sm:$0xff]  ;;  %s1031_s2 = smov 126  }
  0x1c   :  { %580 = vmatpush.bf16.msra.mxu2 %v972_v26 }
  0x1d   :  { %593 = vmatpush.bf16.msra.mxu3 %v980_v27 }
  0x1e   :  { %555 = vmatpush.bf16.msra.mxu0 %v955_v28 }
  0x1f   :  { %568 = vmatpush.bf16.msra.mxu1 %v963_v29 }
  0x20   :  { %581 = vmatpush.bf16.msra.mxu2 %v971_v30 }
  0x21   :  { %594 = vmatpush.bf16.msra.mxu3 %v979_v31  ;;  %556 = vmatmul.bf16.vlgmr.msra.gmra.mxu0 %v24_v41 }
  0x22   :  { %600 = vmatpush.bf16.msrb.mxu0 %v994_v32  ;;  %569 = vmatmul.bf16.vlgmr.msra.gmra.mxu1 %v25_v43 }
  0x23   :  { %613 = vmatpush.bf16.msrb.mxu1 %v1002_v35  ;;  %582 = vmatmul.bf16.vlgmr.msra.gmra.mxu2 %v26_v40 }
  0x24   :  { %626 = vmatpush.bf16.msrb.mxu2 %v1010_v38  ;;  %595 = vmatmul.bf16.vlgmr.msra.gmra.mxu3 %v27_v42 }
  0x25   :  { %639 = vmatpush.bf16.msrb.mxu3 %v1018_v39 }
  0x26   :  { %601 = vmatpush.bf16.msrb.mxu0 %v993_v44 }
  0x27   :  { %614 = vmatpush.bf16.msrb.mxu1 %v1001_v45 }
  0x28   :  { %627 = vmatpush.bf16.msrb.mxu2 %v1009_v46 }
  0x29   :  { %640 = vmatpush.bf16.msrb.mxu3 %v1017_v47 }
  0x2a   :  { %602 = vmatpush.bf16.msrb.mxu0 %v992_v48 }
  0x2b   :  { %615 = vmatpush.bf16.msrb.mxu1 %v1000_v49 }
  0x2c   :  { %628 = vmatpush.bf16.msrb.mxu2 %v1008_v50 }
  0x2d   :  { %641 = vmatpush.bf16.msrb.mxu3 %v1016_v51 }
  0x2e   :  { %603 = vmatpush.bf16.msrb.mxu0 %v991_v52 }
  0x2f   :  { %616 = vmatpush.bf16.msrb.mxu1 %v999_v53 }
  0x30   :  { %629 = vmatpush.bf16.msrb.mxu2 %v1007_v54 }
  0x31   :  { %642 = vmatpush.bf16.msrb.mxu3 %v1015_v55 }
  0x32   :  { %604 = vmatpush.bf16.msrb.mxu0 %v990_v56 }
  0x33   :  { %617 = vmatpush.bf16.msrb.mxu1 %v998_v57 }
  0x34   :  { %630 = vmatpush.bf16.msrb.mxu2 %v1006_v58 }
  0x35   :  { %643 = vmatpush.bf16.msrb.mxu3 %v1014_v59 }
  0x36   :  { %605 = vmatpush.bf16.msrb.mxu0 %v989_v60 }
  0x37   :  { %618 = vmatpush.bf16.msrb.mxu1 %v997_v61 }
  0x38   :  { %631 = vmatpush.bf16.msrb.mxu2 %v1005_v62 }
  0x39   :  { %644 = vmatpush.bf16.msrb.mxu3 %v1013_v63 }
  0x3a   :  { %606 = vmatpush.bf16.msrb.mxu0 %v988_v0 }
  0x3b   :  { %619 = vmatpush.bf16.msrb.mxu1 %v996_v1 }
  0x3c   :  { %632 = vmatpush.bf16.msrb.mxu2 %v1004_v2 }
  0x3d   :  { %645 = vmatpush.bf16.msrb.mxu3 %v1012_v3 }
  0x3e   :  { %607 = vmatpush.bf16.msrb.mxu0 %v987_v4 }
  0x3f   :  { %620 = vmatpush.bf16.msrb.mxu1 %v995_v5 }
  0x40   :  { %633 = vmatpush.bf16.msrb.mxu2 %v1003_v6 }
  0x41   :  { %646 = vmatpush.bf16.msrb.mxu3 %v1011_v9  ;;  %608 = vmatmul.bf16.vlgmr.msrb.gmra.mxu0 %v28_v12 }
  0x42   :  { %621 = vmatmul.bf16.vlgmr.msrb.gmra.mxu1 %v29_v13 }
  0x43   :  { %634 = vmatmul.bf16.vlgmr.msrb.gmra.mxu2 %v30_v14 }
  0x44   :  { %647 = vmatmul.bf16.vlgmr.msrb.gmra.mxu3 %v31_v15 }
  0x9e   :  { %v557_v16 = vpop.f32.mrf.mxu0 }
  0x9f   :  { %v570_v17 = vpop.f32.mrf.mxu1  ;;  %v558_v25 = vadd.f32 %v1022_v22, %v557_v16 }
  0xa1   :  { %v571_v26 = vadd.f32 %v570_v17, %v558_v25 }
  0xa6   :  { %v583_v18 = vpop.f32.mrf.mxu2  ;;  %v559_v20 = vpop.f32.mrf.mxu0 }
  0xa7   :  { %v596_v19 = vpop.f32.mrf.mxu3  ;;  %v572_v21 = vpop.f32.mrf.mxu1  ;;  %v584_v27 = vadd.f32 %v583_v18, %v571_v26 }
  0xa9   :  { %v597_v28 = vadd.f32 %v596_v19, %v584_v27 }
  0xae   :  { %v585_v23 = vpop.f32.mrf.mxu2 }
  0xaf   :  { %v598_v24 = vpop.f32.mrf.mxu3 }
  0xbe   :  { %v609_v29 = vpop.f32.mrf.mxu0 }
  0xbf   :  { %v622_v30 = vpop.f32.mrf.mxu1  ;;  %v610_v31 = vadd.f32 %v609_v29, %v597_v28 }
  0xc1   :  { %v623_v32 = vadd.f32 %v622_v30, %v610_v31 }
  0xc6   :  { %v635_v33 = vpop.f32.mrf.mxu2  ;;  %v611_v36 = vpop.f32.mrf.mxu0 }
  0xc7   :  { %v648_v34 = vpop.f32.mrf.mxu3  ;;  %v636_v35 = vadd.f32 %v635_v33, %v623_v32  ;;  %v624_v37 = vpop.f32.mrf.mxu1 }
  0xc9   :  { %v649_v38 = vadd.f32 %v648_v34, %v636_v35 }
  0xcb   :  { %1023 = vtanh.f32 %v649_v38  ;;  %v954_v42 = vmul.f32 -1.442695, %v649_v38 }
  0xcd   :  { %1025 = vpow2.f32 %v954_v42 }
  0xce   :  { %v637_v39 = vpop.f32.mrf.mxu2 }
  0xcf   :  { %v650_v40 = vpop.f32.mrf.mxu3 }
  0xd1   :  { %v1024_v41 = vpop.eup %1023 }
  0xd2   :  { %673 = vrot.lane.b32.xlu0 %v1024_v41, %s1031_s2 }
  0xd3   :  { %v1026_v43 = vpop.eup %1025 }
  0xd4   :  { %v655_v44 = vadd.f32 1.0, %v1026_v43 }
  0xd6   :  { %1027 = vrcp.f32 %v655_v44  ;;  %v667_v50 = vand.u32 2147483648, %v655_v44  ;;  %vm661_vm1 = vweird.f32 %v655_v44  ;;  %v665_v51 = vand.u32 2147483647, %v655_v44 }
  0xd8   :  { %v668_v53 = vor.u32 1.1754944e-38, %v667_v50  ;;  %vm666_vm3 = vcmp.eq.f32.partialorder %v665_v51, 8.507059e+37 }
  0xdc   :  { %v1028_v45 = vpop.eup %1027 }
  0xdd   :  { %v657_v46 = vmul.f32 %v1028_v45, %v655_v44  ;;  %vm662_vm0 = vweird.f32 %v1028_v45 }
  0xde   :  { %vm663_vm2 = vmor %vm661_vm1, %vm662_vm0 }
  0xdf   :  { %v658_v47 = vsub.f32 1.0, %v657_v46 }
  0xe1   :  { %v659_v48 = vmul.f32 %v1028_v45, %v658_v47 }
  0xe3   :  { %v660_v49 = vadd.f32 %v1028_v45, %v659_v48 }
  0xe5   :  { %v664_v52 = vsel %vm663_vm2, %v1028_v45, %v660_v49 }
  0xe6   :  { %v669_v55 = vsel %vm666_vm3, %v668_v53, %v664_v52 }
 0x144   :  { %v674_v54 = vpop.permute.xlu0 %673 }
 0x145   :  { %v676_v56 = vmul.f32 %v674_v54, %v669_v55 }
 0x147   :  { %1029 = vtanh.f32 %v676_v56  ;;  %689 = vst.msk [vmem:[%s1287_s4] sm:$0xff] %vm687_vm4, %v676_v56 }
 0x14d   :  { %v1030_v57 = vpop.eup %1029 }
 0x14e   :  { %679 = vrot.lane.b32.xlu0 %v1030_v57, %s1032_s5 }
 0x1c0   :  { %v680_v58 = vpop.permute.xlu0 %679 }
 0x1c1   :  { %v682_v59 = vmul.f32 %v680_v58, %v669_v55 }
 0x1c3   :  { %684 = vrot.lane.b32.xlu1 %v682_v59, %s1033_s6 }
 0x235   :  { %v685_v60 = vpop.permute.xlu1 %684 }
 0x236   :  { %688 = vst.msk [vmem:[%s1288_s3] sm:$0xff] %vm687_vm4, %v685_v60 }

</bundles_post_ra>
